<compile_context>
chip_gen: v7x
topology: tpu7x:2x2x1
jax: 0.10.0
libtpu: 0.0.40
codegen_flags: <defaults>
</compile_context>

<pallas_src>
import jax
import jax.numpy as jnp
import numpy as np
from jax import lax
from jax.experimental import pallas as pl
from jax.experimental.pallas import tpu as pltpu

# ----------------------- module configuration -----------------------
BATCH = 2
C_IN = 4             # in_planes
PLANES = 8           # planes (hidden size)
IMG = 16             # image_size (stride=1 keeps the spatial size)
KS = 3               # kernel_sz        (conv1)
KSS = 1              # kernel_size_S    (degree convs, 1x1)
STRIDE = 1
PAD1 = KS // 2
ND = 3               # n_degree
N_CLASSES = 10
HW = IMG * IMG
TOTAL = PLANES * HW                      # classifier in-features = planes*image_size^2
BN_EPS = 1e-5
CENTER = (KS // 2) * KS + (KS // 2)      # centre tap index of the 3x3 window
KK = KS * KS * C_IN                      # 36 im2col columns


# ------------------------------ kernel -------------------------------
def _ncp_fused_kernel(pt_ref, wconv_ref, bias_ref, alpha_ref, cwt_ref, cb_ref,
                      o_ref):
    """Whole NCP_Conv forward in one launch.

    pt_ref   : (KK, B*HW)        f32  transposed im2col patches (built in XLA)
    wconv_ref: (ND*PLANES, KK)   f32  all conv branches, BN scale folded (pre-T)
    bias_ref : (ND*PLANES, 1)    f32  folded BN bias, channel-major
    alpha_ref: (ND-1,)           f32  [SMEM] alpha_{i+1} scalars
    cwt_ref  : (PLANES, N_CLASSES, HW) f32  classifier weight, lane-dense
    cb_ref   : (1, N_CLASSES)    f32  classifier bias
    o_ref    : (B, N_CLASSES)    f32  logits
    """
    # 1) ONE MXU dot for conv1 AND every 1x1 degree conv (their weights sit in
    #    the centre-tap columns of the shared matrix).  Output is already
    #    channel-major and lane-dense (last dim = B*HW = 512); folded BN bias
    #    is a per-sublane add.
    act = jnp.dot(wconv_ref[...], pt_ref[...],
                  preferred_element_type=jnp.float32) + bias_ref[...]   # (24, 512)

    # 2) NCP recurrence (f32 on the VPU): out = conv_{i+1}(z) * (1 + alpha * out).
    #    Sublane slices at multiples of PLANES=8 are tile-aligned.
    out = act[0:PLANES, :]
    for i in range(1, ND):
        out1 = act[i * PLANES:(i + 1) * PLANES, :]
        out = out1 * (1.0 + alpha_ref[i - 1] * out)                     # (8, 512)

    # 3) Classifier: per-batch dot_general against the lane-dense (8,10,256)
    #    weight.  The NCHW flatten is implicit: contract HW on the MXU (batched
    #    over PLANES), then reduce PLANES with a sublane sum.  The per-batch
    #    slice is lane-aligned (offset 0 / 256).
    rows = []
    for b in range(BATCH):
        ob = out[:, b * HW:(b + 1) * HW].reshape(PLANES, 1, HW)         # (8,1,256)
        p = jnp.einsum('cqh,cnh->cqn', ob, cwt_ref[...],
                       preferred_element_type=jnp.float32)              # (8,1,10)
        rows.append(jnp.sum(p.reshape(PLANES, N_CLASSES),
                            axis=0, keepdims=True))                     # (1,10)
    o_ref[...] = jnp.concatenate(rows, axis=0) + cb_ref[...]


# --------------------------- pallas wrapper ---------------------------
@jax.jit
def ncp_forward(x_nchw, packed):
    """Pallas forward of NCP_Conv (config above): one fused kernel launch."""
    # Full im2col in the XLA wrapper (few tens of KB): NCHW -> NHWC, pad, stack
    # the 3x3 window shifts, transpose to (KK, B*HW) so the kernel's main GEMM
    # emits channel-major activations with zero in-kernel relayout.
    x = jnp.transpose(x_nchw, (0, 2, 3, 1))                             # (B,16,16,4)
    xpad = jnp.pad(x, ((0, 0), (PAD1, PAD1), (PAD1, PAD1), (0, 0)))     # (B,18,18,4)
    cols = [xpad[:, ky:ky + IMG, kx:kx + IMG, :].reshape(BATCH * HW, C_IN)
            for ky in range(KS) for kx in range(KS)]
    patches_t = jnp.concatenate(cols, axis=1).T                          # (36, 512)
    patches_t = patches_t.astype(jnp.float32)

    return pl.pallas_call(
        _ncp_fused_kernel,
        out_shape=jax.ShapeDtypeStruct((BATCH, N_CLASSES), jnp.float32),
        in_specs=[
            pl.BlockSpec(memory_space=pltpu.MemorySpace.VMEM),   # patches_t
            pl.BlockSpec(memory_space=pltpu.MemorySpace.VMEM),   # wconv (24,36)
            pl.BlockSpec(memory_space=pltpu.MemorySpace.VMEM),   # bias  (24,1)
            pl.BlockSpec(memory_space=pltpu.MemorySpace.SMEM),   # alpha scalars
            pl.BlockSpec(memory_space=pltpu.MemorySpace.VMEM),   # cwt (8,10,256)
            pl.BlockSpec(memory_space=pltpu.MemorySpace.VMEM),   # cb  (1,10)
        ],
        out_specs=pl.BlockSpec(memory_space=pltpu.MemorySpace.VMEM),
        # Actual footprint is < 300 KiB; small limit leaves scoped-VMEM headroom.
        compiler_params=pltpu.CompilerParams(vmem_limit_bytes=2 * 1024 * 1024),
    )(patches_t, packed["wconv"], packed["bias"], packed["alpha"],
      packed["cwt"], packed["cb"])


# ----------------------- one-time weight packing -----------------------
def prepare_params(params):
    """Hoisted out of the jitted forward: fold eval-mode BN into the conv
    weights, embed the 1x1 degree convs into the centre tap of the shared 3x3
    im2col weight matrix (stored pre-transposed, channel-major), and reshape the
    classifier weight into the lane-dense (PLANES, N_CLASSES, HW) layout."""
    wrows, biases = [], []
    for i in range(1, ND + 1):
        w = params[f"conv{i}_w"]                                         # (8,4,k,k)
        s = params[f"bn{i}_gamma"] / jnp.sqrt(params[f"bn{i}_var"] + BN_EPS)
        t = params[f"bn{i}_beta"] - params[f"bn{i}_mean"] * s
        # (Cout, Cin, kh, kw) -> (Cout, kh*kw*Cin), column order (ky, kx, ci).
        rows = jnp.transpose(w, (0, 2, 3, 1)).reshape(PLANES, -1) * s[:, None]
        if i == 1:                                   # 3x3 conv: full window
            full = rows
        else:                                        # 1x1 conv -> centre-tap cols
            full = jnp.zeros((PLANES, KK), jnp.float32)
            full = full.at[:, CENTER * C_IN:(CENTER + 1) * C_IN].set(rows)
        wrows.append(full)
        biases.append(t)
    # Classifier weight (10, 2048) -> (PLANES, N_CLASSES, HW): lane-dense minor
    # dim (256), no (2048,10)->(2048,128) VMEM padding blow-up.
    cwt3 = params["C_w"].reshape(N_CLASSES, PLANES, HW).transpose(1, 0, 2)
    return {
        "wconv": jnp.concatenate(wrows, axis=0).astype(jnp.float32),     # (24, 36)
        "bias": jnp.concatenate(biases).reshape(ND * PLANES, 1)
                   .astype(jnp.float32),                                 # (24, 1)
        "alpha": jnp.concatenate(
            [params[f"alpha{i}"].reshape(-1) for i in range(2, ND + 1)]
        ).astype(jnp.float32),                                           # (ND-1,)
        "cwt": cwt3.astype(jnp.float32),                                 # (8,10,256)
        "cb": params["C_b"].reshape(1, N_CLASSES).astype(jnp.float32),   # (1, 10)
    }


# --------------------------- reference (plain JAX) ---------------------------
def reference_forward(x_nchw, params):
    """Faithful NCP_Conv.forward (eval-mode BN) in f32 / HIGHEST precision."""
    def conv(x, w, pad):
        return lax.conv_general_dilated(
            x, w, window_strides=(STRIDE, STRIDE),
            padding=[(pad, pad), (pad, pad)],
            dimension_numbers=("NCHW", "OIHW", "NCHW"),
            precision=lax.Precision.HIGHEST)

    def bn(y, i):
        g = params[f"bn{i}_gamma"][None, :, None, None]
        b = params[f"bn{i}_beta"][None, :, None, None]
        m = params[f"bn{i}_mean"][None, :, None, None]
        v = params[f"bn{i}_var"][None, :, None, None]
        return (y - m) / jnp.sqrt(v + BN_EPS) * g + b

    out = bn(conv(x_nchw, params["conv1_w"], PAD1), 1)
    for i in range(2, ND + 1):
        out1 = bn(conv(x_nchw, params[f"conv{i}_w"], KSS // 2), i)
        out = out1 * (1.0 + params[f"alpha{i}"].reshape(()) * out)
    out = out.reshape(BATCH, -1)
    return (jnp.dot(out, params["C_w"].T, precision=lax.Precision.HIGHEST)
            + params["C_b"])


# ----------------------------- parameter init -----------------------------
def init_params(key):
    ks = iter(jax.random.split(key, 32))
    p = {"conv1_w": 0.15 * jax.random.normal(next(ks), (PLANES, C_IN, KS, KS),
                                             jnp.float32)}
    for i in range(2, ND + 1):
        p[f"conv{i}_w"] = 0.3 * jax.random.normal(
            next(ks), (PLANES, C_IN, KSS, KSS), jnp.float32)
        # PyTorch inits alpha to 0; use non-trivial values so the polynomial
        # recurrence is actually exercised by the numerical check.
        p[f"alpha{i}"] = 0.5 * jax.random.normal(next(ks), (1,), jnp.float32)
    for i in range(1, ND + 1):
        p[f"bn{i}_gamma"] = 1.0 + 0.1 * jax.random.normal(next(ks), (PLANES,),
                                                          jnp.float32)
        p[f"bn{i}_beta"] = 0.1 * jax.random.normal(next(ks), (PLANES,), jnp.float32)
        p[f"bn{i}_mean"] = 0.1 * jax.random.normal(next(ks), (PLANES,), jnp.float32)
        p[f"bn{i}_var"] = jax.random.uniform(next(ks), (PLANES,), jnp.float32,
                                             0.5, 1.5)
    p["C_w"] = 0.05 * jax.random.normal(next(ks), (N_CLASSES, TOTAL), jnp.float32)
    p["C_b"] = 0.05 * jax.random.normal(next(ks), (N_CLASSES,), jnp.float32)
    return p


if __name__ == "__main__":
    key = jax.random.PRNGKey(0)
    kx_, kp = jax.random.split(key)
    x = jax.random.normal(kx_, (BATCH, C_IN, IMG, IMG), jnp.float32)
    params = init_params(kp)

    packed = prepare_params(params)
    logits = jax.block_until_ready(ncp_forward(x, packed))
    assert logits.shape == (BATCH, N_CLASSES)

    ref = jax.block_until_ready(reference_forward(x, params))
    np.testing.assert_allclose(np.asarray(logits), np.asarray(ref),
                               rtol=5e-3, atol=5e-3)

    print("KERNEL_OK")
</pallas_src>

<mosaic_0001>
module attributes {stable_mosaic.version = 11 : i64} {
  func.func @_ncp_fused_kernel(%arg0: memref<36x512xf32, #tpu.memory_space<vmem>>, %arg1: memref<24x36xf32, #tpu.memory_space<vmem>>, %arg2: memref<24x1xf32, #tpu.memory_space<vmem>>, %arg3: memref<2xf32, #tpu.memory_space<smem>>, %arg4: memref<8x10x256xf32, #tpu.memory_space<vmem>>, %arg5: memref<1x10xf32, #tpu.memory_space<vmem>>, %arg6: memref<2x10xf32, #tpu.memory_space<vmem>>) attributes {dimension_semantics = [], scalar_prefetch = 0 : i64, scratch_operands = 0 : i64, tpu.core_type = #tpu.core_type<tc>} {
    %c0 = arith.constant 0 : index
    %c0_0 = arith.constant 0 : index
    %0 = vector.load %arg1[%c0, %c0_0] : memref<24x36xf32, #tpu.memory_space<vmem>>, vector<24x36xf32>
    %c0_1 = arith.constant 0 : index
    %c0_2 = arith.constant 0 : index
    %1 = vector.load %arg0[%c0_1, %c0_2] : memref<36x512xf32, #tpu.memory_space<vmem>>, vector<36x512xf32>
    %cst = arith.constant dense<0.000000e+00> : vector<24x512xf32>
    %2 = tpu.matmul %0, %1, %cst {dimension_numbers = #tpu.dot_dimension_numbers<[1], [0], [0], [1], [0, 0, 1, 1], [], []>} : vector<24x36xf32>, vector<36x512xf32>, vector<24x512xf32> -> vector<24x512xf32>
    %c0_3 = arith.constant 0 : index
    %c0_4 = arith.constant 0 : index
    %3 = vector.load %arg2[%c0_3, %c0_4] : memref<24x1xf32, #tpu.memory_space<vmem>>, vector<24x1xf32>
    %4 = vector.broadcast %3 : vector<24x1xf32> to vector<24x512xf32>
    %5 = arith.addf %2, %4 : vector<24x512xf32>
    %6 = vector.extract_strided_slice %5 {offsets = [0, 0], sizes = [8, 512], strides = [1, 1]} : vector<24x512xf32> to vector<8x512xf32>
    %7 = vector.extract_strided_slice %5 {offsets = [8, 0], sizes = [8, 512], strides = [1, 1]} : vector<24x512xf32> to vector<8x512xf32>
    %c0_5 = arith.constant 0 : index
    %8 = memref.load %arg3[%c0_5] : memref<2xf32, #tpu.memory_space<smem>>
    %9 = vector.broadcast %8 : f32 to vector<8x512xf32>
    %10 = arith.mulf %9, %6 : vector<8x512xf32>
    %cst_6 = arith.constant 1.000000e+00 : f32
    %11 = vector.broadcast %cst_6 : f32 to vector<8x512xf32>
    %12 = arith.addf %11, %10 : vector<8x512xf32>
    %13 = arith.mulf %7, %12 : vector<8x512xf32>
    %14 = vector.extract_strided_slice %5 {offsets = [16, 0], sizes = [8, 512], strides = [1, 1]} : vector<24x512xf32> to vector<8x512xf32>
    %c1 = arith.constant 1 : index
    %15 = memref.load %arg3[%c1] : memref<2xf32, #tpu.memory_space<smem>>
    %16 = vector.broadcast %15 : f32 to vector<8x512xf32>
    %17 = arith.mulf %16, %13 : vector<8x512xf32>
    %cst_7 = arith.constant 1.000000e+00 : f32
    %18 = vector.broadcast %cst_7 : f32 to vector<8x512xf32>
    %19 = arith.addf %18, %17 : vector<8x512xf32>
    %20 = arith.mulf %14, %19 : vector<8x512xf32>
    %21 = vector.extract_strided_slice %20 {offsets = [0, 0], sizes = [8, 256], strides = [1, 1]} : vector<8x512xf32> to vector<8x256xf32>
    %22 = vector.shape_cast %21 : vector<8x256xf32> to vector<8x1x256xf32>
    %c0_8 = arith.constant 0 : index
    %c0_9 = arith.constant 0 : index
    %c0_10 = arith.constant 0 : index
    %23 = vector.load %arg4[%c0_8, %c0_9, %c0_10] : memref<8x10x256xf32, #tpu.memory_space<vmem>>, vector<8x10x256xf32>
    "tpu.trace_start"() <{level = 10 : i32, message = "cqh,cnh->cqn"}> : () -> ()
    %cst_11 = arith.constant dense<0.000000e+00> : vector<8x1x10xf32>
    %24 = tpu.matmul %22, %23, %cst_11 {dimension_numbers = #tpu.dot_dimension_numbers<[2], [2], [1], [1], [0, 0, 0, 1, 1, 1], [0], [0]>} : vector<8x1x256xf32>, vector<8x10x256xf32>, vector<8x1x10xf32> -> vector<8x1x10xf32>
    "tpu.trace_stop"() : () -> ()
    %25 = vector.shape_cast %24 : vector<8x1x10xf32> to vector<8x10xf32>
    %cst_12 = arith.constant dense<0.000000e+00> : vector<10xf32>
    %26 = vector.multi_reduction <add>, %25, %cst_12 [0] : vector<8x10xf32> to vector<10xf32>
    %27 = vector.shape_cast %26 : vector<10xf32> to vector<1x10xf32>
    %28 = vector.extract_strided_slice %20 {offsets = [0, 256], sizes = [8, 256], strides = [1, 1]} : vector<8x512xf32> to vector<8x256xf32>
    %29 = vector.shape_cast %28 : vector<8x256xf32> to vector<8x1x256xf32>
    %c0_13 = arith.constant 0 : index
    %c0_14 = arith.constant 0 : index
    %c0_15 = arith.constant 0 : index
    %30 = vector.load %arg4[%c0_13, %c0_14, %c0_15] : memref<8x10x256xf32, #tpu.memory_space<vmem>>, vector<8x10x256xf32>
    "tpu.trace_start"() <{level = 10 : i32, message = "cqh,cnh->cqn"}> : () -> ()
    %cst_16 = arith.constant dense<0.000000e+00> : vector<8x1x10xf32>
    %31 = tpu.matmul %29, %30, %cst_16 {dimension_numbers = #tpu.dot_dimension_numbers<[2], [2], [1], [1], [0, 0, 0, 1, 1, 1], [0], [0]>} : vector<8x1x256xf32>, vector<8x10x256xf32>, vector<8x1x10xf32> -> vector<8x1x10xf32>
    "tpu.trace_stop"() : () -> ()
    %32 = vector.shape_cast %31 : vector<8x1x10xf32> to vector<8x10xf32>
    %cst_17 = arith.constant dense<0.000000e+00> : vector<10xf32>
    %33 = vector.multi_reduction <add>, %32, %cst_17 [0] : vector<8x10xf32> to vector<10xf32>
    %34 = vector.shape_cast %33 : vector<10xf32> to vector<1x10xf32>
    %35 = tpu.concatenate %27, %34 in 0 : vector<1x10xf32>, vector<1x10xf32> -> vector<2x10xf32>
    %c0_18 = arith.constant 0 : index
    %c0_19 = arith.constant 0 : index
    %36 = vector.load %arg5[%c0_18, %c0_19] : memref<1x10xf32, #tpu.memory_space<vmem>>, vector<1x10xf32>
    %37 = vector.broadcast %36 : vector<1x10xf32> to vector<2x10xf32>
    %38 = arith.addf %35, %37 : vector<2x10xf32>
    %c0_20 = arith.constant 0 : index
    %c0_21 = arith.constant 0 : index
    %39 = vector.load %arg6[%c0_20, %c0_21] : memref<2x10xf32, #tpu.memory_space<vmem>>, vector<2x10xf32>
    tpu.vector_store %arg6[%c0_20, %c0_21], %38 {strides = array<i32>} : memref<2x10xf32, #tpu.memory_space<vmem>>, vector<2x10xf32>,
    return
  }
}

</mosaic_0001>

<bundles_post_ra>
// kernel: ncp_forward.1
= control target key start
LH: loop header
LB: loop body
LE: loop exit
PB: predicated region body
PF: predicated region fallthrough
CT: control target
= control target key end

     0   :  { %11 = vsyncpa [#allocation4], 0  ;;  %s2412_s0 = inlined_call_operand.vmem [shape: f32[36,512], index: 0, kind: input, shape index: {}]   ;;  %s2413_s1 = inlined_call_operand.vmem [shape: f32[24,36], index: 1, kind: input, shape index: {}]   ;;  %s2414_s2 = inlined_call_operand.vmem [shape: f32[24,1], index: 2, kind: input, shape index: {}]   ;;  %s2415_s3 = inlined_call_operand.vmem [shape: f32[2], index: 3, kind: input, shape index: {}]   ;;  %s2416_s4 = inlined_call_operand.vmem [shape: f32[8,10,256], index: 4, kind: input, shape index: {}]   ;;  %s2417_s5 = inlined_call_operand.vmem [shape: f32[1,10], index: 5, kind: input, shape index: {}]   ;;  %s2418_s6 = inlined_call_operand.hbm [shape: f32[2,10], index: 6, kind: output, shape index: {}]  }
   0x1   :  { %12 = vsyncpa [#allocation3], 0  ;;  %s25_s23 = sshll.u32 %s2415_s3, 4  ;;  %s26_s23 = int_to_ptr.vmem [resolvable:$true] %s25_s23 }
   0x2   :  { %s1940_s24 = scalar_lea.vmem %s26_s23, 16  ;;  %p1945_p1 = scmp.lt.s32.totalorder %s26_s23, %s26_s23 }
   0x3   :  { %p1941_p0 = scmp.ne.s32.totalorder %s26_s23, %s1940_s24  ;;  %p1946_p2 = scmp.lt.s32.totalorder %s1940_s24, %s1940_s24 }
   0x5   :  { %p1947_p3 = por %p1946_p2, %p1945_p1 }
   0x7   :  { %p1948_p4 = pnand %p1947_p3, %p1941_p0 }
   0x9   :  { %1951 = shalt.err (!%p1948_p4)
}
   0xa   :  { %s1978_s25 = smov [#allocation2]  }
   0xb   :  { %28 = dma.vmem_to_smem %s26_s23, 16, %s1978_s25, [#allocation4]  }
   0xc   :  { %1974 = dma.done.wait [#allocation4], 16  }
   0xd   :  { %1975 = vsyncadd [#allocation4], 4294967280 }
   0xe   :  { %36 = sfence }
   0xf   :  { %v41_v0 = vld [vmem:[%s2412_s0 + $0x8] sm:$0xff]  ;;  %v43_v2 = vld [vmem:[%s2412_s0 + $0x18] sm:$0xff]  ;;  %v40_v5 = vld [vmem:[%s2412_s0] sm:$0xff]  ;;  %v1979_v7 = vmov 0.0   ;;  %v1980_v13 = vmov 0   ;;  %vm88_vm0 = vcmask 1043456  }
  0x10   :  { %v45_v1 = vld [vmem:[%s2412_s0 + $0x28] sm:$0xff]  ;;  %v47_v4 = vld [vmem:[%s2412_s0 + $0x38] sm:$0xff]  ;;  %v44_v6 = vld [vmem:[%s2412_s0 + $0x20] sm:$0xff]  ;;  %165 = vmatprep.mubr.f32.mxu0 %v1979_v7  ;;  %248 = vmatprep.mubr.f32.mxu1 %v1979_v7  ;;  %vm78_vm1 = vcmask 293888   ;;  %s1851_s24 = sld [smem:[#allocation2 + $0x1]]  ;;  %vm1028_vm2 = vcmask 1041409  }
  0x11   :  { %v1853_v3 = vpack.c.bf16 %v45_v1, %v41_v0  ;;  %v1861_v8 = vpack.c.bf16 %v47_v4, %v43_v2  ;;  %v1855_v9 = vpack.c.bf16 %v44_v6, %v40_v5  ;;  %v42_v10 = vld [vmem:[%s2412_s0 + $0x10] sm:$0xff]  ;;  %v49_v12 = vld [vmem:[%s2412_s0 + $0x48] sm:$0xff]  ;;  %1938 = vset.pattern.permute.xlu0 %v1980_v13  ;;  %1939 = vset.pattern.permute.xlu1 %v1980_v13  ;;  %v51_v16 = vld [vmem:[%s2412_s0 + $0x58] sm:$0xff]  ;;  %v1981_v6 = vmov 1966171168   ;;  %s1982_s15 = smov [#allocation5]  }
  0x12   :  { %v46_v11 = vld [vmem:[%s2412_s0 + $0x30] sm:$0xff]  ;;  %v53_v15 = vld [vmem:[%s2412_s0 + $0x68] sm:$0xff]  ;;  %v55_v17 = vld [vmem:[%s2412_s0 + $0x78] sm:$0xff]  ;;  %v302_v13 = vlaneseq  ;;  %vm1031_vm3 = vcmask 1042434   ;;  %vm1034_vm4 = vcmask 1043459   ;;  %vm1037_vm5 = vcmask 1044484  }
  0x13   :  { %1854 = vmatprep.subr.bf16.mxu0 %v1853_v3  ;;  %v1863_v14 = vpack.c.bf16 %v46_v11, %v42_v10  ;;  %1862 = vmatprep.subr.bf16.mxu1 %v1861_v8  ;;  %v1857_v18 = vpack.c.bf16 %v53_v15, %v49_v12  ;;  %v1865_v19 = vpack.c.bf16 %v55_v17, %v51_v16  ;;  %v48_v20 = vld [vmem:[%s2412_s0 + $0x40] sm:$0xff]  ;;  %v50_v22 = vld [vmem:[%s2412_s0 + $0x50] sm:$0xff]  ;;  %v57_v26 = vld [vmem:[%s2412_s0 + $0x88] sm:$0xf]  ;;  %vm1040_vm6 = vcmask 1045509   ;;  %s1832_s16 = sshll.u32 %s1982_s15, 4  ;;  %s1833_s16 = int_to_ptr.vmem [resolvable:$true] %s1832_s16 }
  0x14   :  { %1856 = vmatpush1.bf16.msra.mxu0 %v1855_v9  ;;  %v52_v21 = vld [vmem:[%s2412_s0 + $0x60] sm:$0xff]  ;;  %v54_v24 = vld [vmem:[%s2412_s0 + $0x70] sm:$0xff]  ;;  %v59_v27 = vld [vmem:[%s2412_s0 + $0x98] sm:$0xf]  ;;  %vm1043_vm7 = vcmask 1046534   ;;  %vm1046_vm8 = vcmask 1047559   ;;  %p1957_p6 = scmp.lt.s32.totalorder %s1833_s16, %s1833_s16 }
  0x15   :  { %1864 = vmatpush1.bf16.msra.mxu1 %v1863_v14  ;;  %v1859_v23 = vpack.c.bf16 %v52_v21, %v48_v20  ;;  %1858 = vmatprep.subr.bf16.mxu0 %v1857_v18  ;;  %v1867_v25 = vpack.c.bf16 %v54_v24, %v50_v22  ;;  %v60_v28 = vld [vmem:[%s2414_s2] sm:$0xff]  ;;  %v62_v29 = vld [vmem:[%s2414_s2 + $0x10] sm:$0xff]  ;;  %v61_v31 = vld [vmem:[%s2414_s2 + $0x8] sm:$0xff]  ;;  %s267_s2 = sld [smem:[#allocation2]]  ;;  %vm1049_vm9 = vcmask 80896   ;;  %vm1814_vm10 = vcmask 1040384  }
  0x16   :  { %1866 = vmatprep.subr.bf16.mxu1 %v1865_v19  ;;  %65 = vperm.xlu0 %1938, %v60_v28   ;;  %v56_v30 = vld [vmem:[%s2412_s0 + $0x80] sm:$0xf]  ;;  %v58_v32 = vld [vmem:[%s2412_s0 + $0x90] sm:$0xf]  ;;  %v38_v34 = vld [vmem:[%s2413_s1 + $0x8] sm:$0xff]  ;;  %v282_v5 = vstv %s1851_s24  ;;  %vm1824_vm11 = vcmask 74752  }
  0x17   :  { %v37_v33 = vld [vmem:[%s2413_s1] sm:$0xff]  ;;  %75 = vperm.xlu1 %1939, %v62_v29   ;;  %v39_v35 = vld [vmem:[%s2413_s1 + $0x10] sm:$0xff]  ;;  %v2112_v36 = vld [vmem:[%s2416_s4 + $0x8] sm:$0xff]  ;;  %s1952_s17 = scalar_lea.vmem %s1833_s16, 32 }
  0x18   :  { %1860 = vmatpush1.bf16.msra.mxu0 %v1859_v23  ;;  %v350_v37 = vld [vmem:[%s2416_s4 + $0x18] sm:$0x3]  ;;  %v2121_v39 = vld [vmem:[%s2416_s4] sm:$0xff]  ;;  %v349_v40 = vld [vmem:[%s2416_s4 + $0x10] sm:$0x3]  ;;  %p1953_p5 = scmp.ne.s32.totalorder %s1833_s16, %s1952_s17  ;;  %p1958_p7 = scmp.lt.s32.totalorder %s1952_s17, %s1952_s17 }
  0x19   :  { %1868 = vmatpush1.bf16.msra.mxu1 %v1867_v25  ;;  %1841 = vmatprep.subr.msk.mxu0 %vm88_vm0, %v57_v26  ;;  %v1869_v38 = vpack.c.bf16 %v350_v37, %v2112_v36  ;;  %v1871_v41 = vpack.c.bf16 %v349_v40, %v2121_v39  ;;  %v2130_v42 = vld [vmem:[%s2416_s4 + $0x28] sm:$0xff]  ;;  %v354_v43 = vld [vmem:[%s2416_s4 + $0x38] sm:$0x3]  ;;  %v2139_v45 = vld [vmem:[%s2416_s4 + $0x20] sm:$0xff] }
  0x1a   :  { %1846 = vmatprep.subr.msk.mxu1 %vm88_vm0, %v59_v27  ;;  %70 = vperm.xlu0 %1938, %v61_v31   ;;  %v1873_v44 = vpack.c.bf16 %v354_v43, %v2130_v42  ;;  %v353_v46 = vld [vmem:[%s2416_s4 + $0x30] sm:$0x3]  ;;  %v2148_v48 = vld [vmem:[%s2416_s4 + $0x48] sm:$0xff]  ;;  %v358_v49 = vld [vmem:[%s2416_s4 + $0x58] sm:$0x3]  ;;  %v303_v31 = vshrl.u32 %v302_v13, 7  ;;  %p1959_p8 = por %p1958_p7, %p1957_p6 }
  0x1b   :  { %v1875_v47 = vpack.c.bf16 %v353_v46, %v2139_v45  ;;  %v1877_v50 = vpack.c.bf16 %v358_v49, %v2148_v48  ;;  %v2157_v51 = vld [vmem:[%s2416_s4 + $0x68] sm:$0xff]  ;;  %v362_v52 = vld [vmem:[%s2416_s4 + $0x78] sm:$0x3]  ;;  %v268_v56 = vstv %s267_s2 }
  0x1c   :  { %1842 = vmatpush1.msk.msra.mxu0 %vm88_vm0, %v56_v30  ;;  %v1881_v53 = vpack.c.bf16 %v362_v52, %v2157_v51  ;;  %v370_v13 = vld [vmem:[%s2416_s4 + $0xb8] sm:$0x3]  ;;  %p1960_p9 = pnand %p1959_p8, %p1953_p5 }
  0x1d   :  { %1847 = vmatpush1.msk.msra.mxu1 %vm88_vm0, %v58_v32  ;;  %1843 = vmatmul.mubr.msk.f32.vlgmr.msra.gmra.mrb[0].mxu0 %vm78_vm1, %v37_v33 }
  0x1e   :  { %1848 = vmatmul.mubr.msk.f32.vlgmr.msra.gmra.mrb[0].mxu1 %vm78_vm1, %v37_v33  ;;  %171 = vmatprep.mubr.f32.mxu0 %v1979_v7 }
  0x1f   :  { %254 = vmatprep.mubr.f32.mxu1 %v1979_v7  ;;  %1870 = vmatprep.subr.bf16.mxu0 %v1869_v38 }
  0x20   :  { %1874 = vmatprep.subr.bf16.mxu1 %v1873_v44 }
  0x21   :  { %1844 = vmatmul.mubr.msk.f32.gmra.mrb[2].mxu0 %vm78_vm1, %v38_v34 }
  0x22   :  { %1849 = vmatmul.mubr.msk.f32.gmra.mrb[2].mxu1 %vm78_vm1, %v38_v34  ;;  %177 = vmatprep.mubr.f32.mxu0 %v1979_v7 }
  0x23   :  { %260 = vmatprep.mubr.f32.mxu1 %v1979_v7  ;;  %1872 = vmatpush1.bf16.xpose.msra.mxu0 %v1871_v41  ;;  %v300_v7 = vunpack.c.l.s4 %v1981_v6  ;;  %v2200_v6 = vld [vmem:[%s2416_s4 + $0x88] sm:$0xff] }
  0x24   :  { %1876 = vmatpush1.bf16.xpose.msra.mxu1 %v1875_v47  ;;  %1878 = vmatprep.subr.bf16.mxu0 %v1877_v50 }
  0x25   :  { %1845 = vmatmul.mubr.msk.f32.gmra.mrb[4].mxu0 %vm78_vm1, %v39_v35  ;;  %1882 = vmatprep.subr.bf16.mxu1 %v1881_v53  ;;  %v301_v26 = vunpack.c.0.s8 %v300_v7 }
  0x26   :  { %1850 = vmatmul.mubr.msk.f32.gmra.mrb[4].mxu1 %vm78_vm1, %v39_v35 }
  0x27   :  { %v2163_v52 = vsub.s32 %v301_v26, %v303_v31  ;;  %v2235_v26 = vld [vmem:[%s2416_s4 + $0xc8] sm:$0xff] }
  0x95   :  { %v66_v54 = vpop.permute.xlu0 %65 }
  0x96   :  { %v76_v19 = vpop.permute.xlu1 %75 }
  0x99   :  { %v71_v2 = vpop.permute.xlu0 %70 }
  0xf0   :  { %v167_v55 = vpop.f32.mrb[0].mxu0 }
  0xf1   :  { %v168_v57 = vadd.f32 %v167_v55, %v66_v54  ;;  %v250_v58 = vpop.f32.mrb[0].mxu1  ;;  %v169_v59 = vpop.f32.mrb[1].mxu0 }
  0xf2   :  { %v251_v60 = vadd.f32 %v250_v58, %v66_v54  ;;  %v170_v61 = vadd.f32 %v169_v59, %v66_v54  ;;  %v252_v62 = vpop.f32.mrb[1].mxu1 }
  0xf3   :  { %v269_v63 = vmul.f32 %v268_v56, %v168_v57  ;;  %v253_v0 = vadd.f32 %v252_v62, %v66_v54  ;;  %v2181_v62 = vld [vmem:[%s2416_s4 + $0x40] sm:$0xff] }
  0xf4   :  { %v271_v1 = vmul.f32 %v268_v56, %v251_v60  ;;  %v270_v3 = vmul.f32 %v268_v56, %v170_v61  ;;  %v173_v4 = vpop.f32.mrb[2].mxu0  ;;  %v2174_v60 = vsub.s32 0, %v303_v31  ;;  %v2176_v61 = vsub.s32 1, %v303_v31 }
  0xf5   :  { %v273_v8 = vadd.f32 1.0, %v269_v63  ;;  %v272_v9 = vmul.f32 %v268_v56, %v253_v0  ;;  %v174_v10 = vadd.f32 %v173_v4, %v71_v2  ;;  %v256_v11 = vpop.f32.mrb[2].mxu1  ;;  %v175_v12 = vpop.f32.mrb[3].mxu0  ;;  %v357_v63 = vld [vmem:[%s2416_s4 + $0x50] sm:$0x3] }
  0xf6   :  { %v275_v14 = vadd.f32 1.0, %v271_v1  ;;  %v274_v15 = vadd.f32 1.0, %v270_v3  ;;  %v257_v16 = vadd.f32 %v256_v11, %v71_v2  ;;  %v176_v17 = vadd.f32 %v175_v12, %v71_v2  ;;  %v258_v18 = vpop.f32.mrb[3].mxu1  ;;  %v361_v3 = vld [vmem:[%s2416_s4 + $0x70] sm:$0x3]  ;;  %v2211_v12 = vld [vmem:[%s2416_s4 + $0xa8] sm:$0xff] }
  0xf7   :  { %v276_v20 = vadd.f32 1.0, %v272_v9  ;;  %v277_v21 = vmul.f32 %v273_v8, %v174_v10  ;;  %v259_v22 = vadd.f32 %v258_v18, %v71_v2  ;;  %v2190_v2 = vld [vmem:[%s2416_s4 + $0x60] sm:$0xff]  ;;  %v366_v11 = vld [vmem:[%s2416_s4 + $0x98] sm:$0x3] }
  0xf8   :  { %v279_v23 = vmul.f32 %v275_v14, %v257_v16  ;;  %v278_v24 = vmul.f32 %v274_v15, %v176_v17  ;;  %v179_v25 = vpop.f32.mrb[4].mxu0  ;;  %v1883_v14 = vpack.c.bf16 %v361_v3, %v2190_v2 }
  0xf9   :  { %v283_v27 = vmul.f32 %v282_v5, %v277_v21  ;;  %v280_v28 = vmul.f32 %v276_v20, %v259_v22  ;;  %v180_v29 = vadd.f32 %v179_v25, %v76_v19  ;;  %v181_v30 = vpop.f32.mrb[5].mxu0  ;;  %v262_v32 = vpop.f32.mrb[4].mxu1  ;;  %v1889_v20 = vpack.c.bf16 %v370_v13, %v2211_v12 }
  0xfa   :  { %v285_v33 = vmul.f32 %v282_v5, %v279_v23  ;;  %v284_v34 = vmul.f32 %v282_v5, %v278_v24  ;;  %v182_v35 = vadd.f32 %v181_v30, %v76_v19  ;;  %v263_v37 = vadd.f32 %v262_v32, %v76_v19  ;;  %v264_v38 = vpop.f32.mrb[5].mxu1  ;;  %v2226_v23 = vld [vmem:[%s2416_s4 + $0x80] sm:$0xff]  ;;  %v365_v24 = vld [vmem:[%s2416_s4 + $0x90] sm:$0x3]  ;;  %v2253_v32 = vld [vmem:[%s2416_s4 + $0xe8] sm:$0xff] }
  0xfb   :  { %v287_v40 = vadd.f32 1.0, %v283_v27  ;;  %v286_v41 = vmul.f32 %v282_v5, %v280_v28  ;;  %v265_v43 = vadd.f32 %v264_v38, %v76_v19  ;;  %v1879_v5 = vpack.c.bf16 %v357_v63, %v2181_v62  ;;  %v374_v27 = vld [vmem:[%s2416_s4 + $0xd8] sm:$0x3]  ;;  %v2243_v28 = vld [vmem:[%s2416_s4 + $0xa0] sm:$0xff] }
  0xfc   :  { %v288_v44 = vadd.f32 1.0, %v284_v34  ;;  %v289_v46 = vadd.f32 1.0, %v285_v33  ;;  %v1885_v19 = vpack.c.bf16 %v366_v11, %v2200_v6  ;;  %v1887_v30 = vpack.c.bf16 %v365_v24, %v2226_v23  ;;  %v378_v33 = vld [vmem:[%s2416_s4 + $0xf8] sm:$0x3] }
  0xfd   :  { %v291_v47 = vmul.f32 %v287_v40, %v180_v29  ;;  %v290_v49 = vadd.f32 1.0, %v286_v41  ;;  %v369_v29 = vld [vmem:[%s2416_s4 + $0xb0] sm:$0x3]  ;;  %v1897_v41 = vpack.c.bf16 %v378_v33, %v2253_v32  ;;  %v1120_v11 = vld [vmem:[%s2416_s4 + $0x58] sm:$0x3] }
  0xfe   :  { %v292_v50 = vmul.f32 %v288_v44, %v182_v35  ;;  %v2165_v53 = vmul.f32 %v289_v46, %v263_v37  ;;  %v1893_v35 = vpack.c.bf16 %v374_v27, %v2235_v26  ;;  %v1891_v38 = vpack.c.bf16 %v369_v29, %v2243_v28  ;;  %v2268_v44 = vld [vmem:[%s2416_s4 + $0xc0] sm:$0xff]  ;;  %v373_v46 = vld [vmem:[%s2416_s4 + $0xd0] sm:$0x3]  ;;  %v1132_v29 = vld [vmem:[%s2416_s4 + $0xb8] sm:$0x3] }
  0xff   :  { %v2167_v54 = vmul.f32 %v290_v49, %v265_v43  ;;  %v1112_v49 = vld [vmem:[%s2416_s4 + $0x18] sm:$0x3] }
 0x100   :  { %v297_v55 = vcombine.low %v291_v47, %v292_v50  ;;  %v298_v56 = vcombine.high %v291_v47, %v292_v50  ;;  %v2279_v50 = vld [vmem:[%s2416_s4 + $0xe0] sm:$0xff]  ;;  %v1901_v3 = vpack.c.bf16 %v1112_v49, %v2112_v36  ;;  %v1111_v36 = vld [vmem:[%s2416_s4 + $0x10] sm:$0x3] }
 0x101   :  { %v1059_v57 = vcombine.low %v2165_v53, %v2167_v54  ;;  %v1060_v58 = vcombine.high %v2165_v53, %v2167_v54  ;;  %v1903_v13 = vpack.c.bf16 %v1111_v36, %v2121_v39  ;;  %v1921_v53 = vpack.c.bf16 %v1132_v29, %v2211_v12  ;;  %v1131_v12 = vld [vmem:[%s2416_s4 + $0xb0] sm:$0x3] }
 0x102   :  { %v305_v59 = vrot.slane %v297_v55, %v2163_v52  ;;  %v312_v4 = vrot.slane %v298_v56, %v2163_v52  ;;  %v377_v55 = vld [vmem:[%s2416_s4 + $0xf0] sm:$0x3] }
 0x103   :  { %v1067_v56 = vrot.slane %v1059_v57, %v2163_v52  ;;  %v1074_v24 = vrot.slane %v1060_v58, %v2163_v52 }
 0x104   :  { %v313_v0 = vcombine.high %v305_v59, %v305_v59  ;;  %v321_v1 = vrot.slane %v305_v59, %v2163_v52  ;;  %v314_v21 = vcombine.high %v312_v4, %v312_v4  ;;  %v328_v25 = vrot.slane %v312_v4, %v2163_v52 }
 0x105   :  { %v1895_v59 = vpack.c.bf16 %v373_v46, %v2268_v44  ;;  %v1076_v54 = vcombine.high %v1074_v24, %v1074_v24 }
 0x106   :  { %v386_v7 = vrot.slane %v321_v1, %v2176_v61  ;;  %v382_v8 = vrot.slane %v321_v1, %v2174_v60  ;;  %v335_v9 = vrot.slane %v313_v0, %v2163_v52  ;;  %v343_v10 = vcombine.high %v321_v1, %v321_v1  ;;  %v1116_v0 = vld [vmem:[%s2416_s4 + $0x38] sm:$0x3] }
 0x107   :  { %v342_v31 = vrot.slane %v314_v21, %v2163_v52  ;;  %v706_v37 = vrot.slane %v328_v25, %v2176_v61  ;;  %v344_v47 = vcombine.high %v328_v25, %v328_v25  ;;  %v702_v1 = vrot.slane %v328_v25, %v2174_v60 }
 0x108   :  { %453 = vmatprep.mubr.f32.mxu0 %v386_v7  ;;  %v466_v15 = vrot.slane %v335_v9, %v2176_v61  ;;  %v546_v16 = vrot.slane %v343_v10, %v2176_v61  ;;  %v462_v17 = vrot.slane %v335_v9, %v2174_v60  ;;  %v345_v18 = vcombine.high %v335_v9, %v335_v9 }
 0x109   :  { %454 = vmatmul.mubr.f32.vlgmr.msra.gmra.mrb[6].mxu0 %v382_v8  ;;  %v542_v34 = vrot.slane %v343_v10, %v2174_v60  ;;  %v786_v43 = vrot.slane %v342_v31, %v2176_v61  ;;  %v346_v63 = vcombine.high %v342_v31, %v342_v31  ;;  %v866_v4 = vrot.slane %v344_v47, %v2176_v61 }
 0x10a   :  { %1880 = vmatpush1.bf16.xpose.msra.mxu0 %v1879_v5  ;;  %533 = vmatprep.mubr.f32.mxu1 %v466_v15  ;;  %v626_v22 = vrot.slane %v345_v18, %v2176_v61  ;;  %v622_v40 = vrot.slane %v345_v18, %v2174_v60  ;;  %v1899_v5 = vpack.c.bf16 %v377_v55, %v2279_v50  ;;  %v1124_v15 = vld [vmem:[%s2416_s4 + $0x78] sm:$0x3] }
 0x10b   :  { %613 = vmatprep.mubr.f32.mxu0 %v546_v16  ;;  %534 = vmatmul.mubr.f32.vlgmr.msra.gmra.mrb[6].mxu1 %v462_v17  ;;  %v782_v7 = vrot.slane %v342_v31, %v2174_v60  ;;  %v1905_v57 = vpack.c.bf16 %v1116_v0, %v2130_v42  ;;  %v1075_v8 = vcombine.high %v1067_v56, %v1067_v56  ;;  %v1115_v42 = vld [vmem:[%s2416_s4 + $0x30] sm:$0x3] }
 0x10c   :  { %1884 = vmatpush1.bf16.xpose.msra.mxu1 %v1883_v14  ;;  %693 = vmatprep.mubr.f32.mxu1 %v626_v22  ;;  %v946_v9 = vrot.slane %v346_v63, %v2176_v61  ;;  %v1083_v10 = vrot.slane %v1067_v56, %v2163_v52  ;;  %v862_v16 = vrot.slane %v344_v47, %v2174_v60  ;;  %v1119_v22 = vld [vmem:[%s2416_s4 + $0x50] sm:$0x3] }
 0x10d   :  { %1886 = vmatprep.subr.bf16.mxu0 %v1885_v19  ;;  %1890 = vmatprep.subr.bf16.mxu1 %v1889_v20  ;;  %v1097_v14 = vrot.slane %v1075_v8, %v2163_v52  ;;  %v1909_v17 = vpack.c.bf16 %v1120_v11, %v2148_v48  ;;  %v1907_v19 = vpack.c.bf16 %v1115_v42, %v2139_v45  ;;  %v1128_v45 = vld [vmem:[%s2416_s4 + $0x98] sm:$0x3] }
 0x10e   :  { %v1148_v18 = vrot.slane %v1083_v10, %v2176_v61  ;;  %v942_v20 = vrot.slane %v346_v63, %v2174_v60  ;;  %v1913_v21 = vpack.c.bf16 %v1124_v15, %v2157_v51  ;;  %v1105_v48 = vcombine.high %v1083_v10, %v1083_v10  ;;  %v1123_v51 = vld [vmem:[%s2416_s4 + $0x70] sm:$0x3] }
 0x10f   :  { %v1228_v39 = vrot.slane %v1097_v14, %v2176_v61  ;;  %v1911_v25 = vpack.c.bf16 %v1119_v22, %v2181_v62  ;;  %v1107_v27 = vcombine.high %v1097_v14, %v1097_v14  ;;  %v1917_v31 = vpack.c.bf16 %v1128_v45, %v2200_v6  ;;  %v1127_v62 = vld [vmem:[%s2416_s4 + $0x90] sm:$0x3]  ;;  %v1136_v6 = vld [vmem:[%s2416_s4 + $0xd8] sm:$0x3] }
 0x110   :  { %v1308_v33 = vrot.slane %v1105_v48, %v2176_v61  ;;  %v1923_v47 = vpack.c.bf16 %v1131_v12, %v2243_v28  ;;  %v1139_v28 = vld [vmem:[%s2416_s4 + $0xf0] sm:$0x3] }
 0x111   :  { %614 = vmatmul.mubr.f32.vlgmr.msra.gmra.mrb[8].mxu0 %v542_v34  ;;  %v1915_v34 = vpack.c.bf16 %v1123_v51, %v2190_v2  ;;  %v1388_v58 = vrot.slane %v1107_v27, %v2176_v61  ;;  %v1090_v2 = vrot.slane %v1074_v24, %v2163_v52  ;;  %v1384_v49 = vrot.slane %v1107_v27, %v2174_v60 }
 0x112   :  { %1888 = vmatpush1.bf16.xpose.msra.mxu0 %v1887_v30  ;;  %773 = vmatprep.mubr.f32.mxu0 %v706_v37  ;;  %v1144_v30 = vrot.slane %v1083_v10, %v2174_v60  ;;  %v1919_v37 = vpack.c.bf16 %v1127_v62, %v2226_v23  ;;  %v1135_v23 = vld [vmem:[%s2416_s4 + $0xd0] sm:$0x3]  ;;  %v1931_v0 = vpack.c.bf16 %v1139_v28, %v2279_v50 }
 0x113   :  { %694 = vmatmul.mubr.f32.vlgmr.msra.gmra.mrb[8].mxu1 %v622_v40  ;;  %1894 = vmatprep.subr.bf16.mxu0 %v1893_v35  ;;  %v1224_v35 = vrot.slane %v1097_v14, %v2174_v60  ;;  %v1140_v40 = vld [vmem:[%s2416_s4 + $0xf8] sm:$0x3]  ;;  %v1468_v46 = vrot.slane %v1090_v2, %v2176_v61 }
 0x114   :  { %1892 = vmatpush1.bf16.xpose.msra.mxu1 %v1891_v38  ;;  %853 = vmatprep.mubr.f32.mxu1 %v786_v43  ;;  %v1104_v38 = vrot.slane %v1076_v54, %v2163_v52  ;;  %v1925_v43 = vpack.c.bf16 %v1136_v6, %v2235_v26  ;;  %v1929_v55 = vpack.c.bf16 %v1140_v40, %v2253_v32 }
 0x115   :  { %1898 = vmatprep.subr.bf16.mxu1 %v1897_v41  ;;  %v1304_v41 = vrot.slane %v1105_v48, %v2174_v60  ;;  %v1106_v26 = vcombine.high %v1090_v2, %v1090_v2  ;;  %v1927_v32 = vpack.c.bf16 %v1135_v23, %v2268_v44 }
 0x116   :  { %v1548_v52 = vrot.slane %v1104_v38, %v2176_v61  ;;  %v1108_v56 = vcombine.high %v1104_v38, %v1104_v38 }
 0x117   :  { %v1628_v63 = vrot.slane %v1106_v26, %v2176_v61 }
 0x118   :  { %v1704_v44 = vrot.slane %v1108_v56, %v2174_v60 }
 0x119   :  { %774 = vmatmul.mubr.f32.vlgmr.msra.gmra.mrb[10].mxu0 %v702_v1  ;;  %v1544_v1 = vrot.slane %v1104_v38, %v2174_v60 }
 0x11a   :  { %1896 = vmatpush1.bf16.xpose.msra.mxu0 %v1895_v59  ;;  %933 = vmatprep.mubr.f32.mxu0 %v866_v4  ;;  %v1464_v59 = vrot.slane %v1090_v2, %v2174_v60  ;;  %v1624_v4 = vrot.slane %v1106_v26, %v2174_v60 }
 0x11b   :  { %854 = vmatmul.mubr.f32.vlgmr.msra.gmra.mrb[10].mxu1 %v782_v7  ;;  %1902 = vmatprep.subr.bf16.mxu0 %v1901_v3  ;;  %v1708_v3 = vrot.slane %v1108_v56, %v2176_v61 }
 0x11c   :  { %1900 = vmatpush1.bf16.xpose.msra.mxu1 %v1899_v5  ;;  %1013 = vmatprep.mubr.f32.mxu1 %v946_v9 }
 0x11d   :  { %1906 = vmatprep.subr.bf16.mxu1 %v1905_v57 }
 0x121   :  { %934 = vmatmul.mubr.f32.vlgmr.msra.gmra.mrb[12].mxu0 %v862_v16 }
 0x122   :  { %1904 = vmatpush1.bf16.xpose.msra.mxu0 %v1903_v13  ;;  %1215 = vmatprep.mubr.f32.mxu0 %v1148_v18 }
 0x123   :  { %1014 = vmatmul.mubr.f32.vlgmr.msra.gmra.mrb[12].mxu1 %v942_v20  ;;  %1910 = vmatprep.subr.bf16.mxu0 %v1909_v17 }
 0x124   :  { %1908 = vmatpush1.bf16.xpose.msra.mxu1 %v1907_v19  ;;  %1295 = vmatprep.mubr.f32.mxu1 %v1228_v39 }
 0x125   :  { %1914 = vmatprep.subr.bf16.mxu1 %v1913_v21 }
 0x129   :  { %1216 = vmatmul.mubr.f32.vlgmr.msra.gmra.mrb[14].mxu0 %v1144_v30 }
 0x12a   :  { %1912 = vmatpush1.bf16.xpose.msra.mxu0 %v1911_v25  ;;  %1375 = vmatprep.mubr.f32.mxu0 %v1308_v33 }
 0x12b   :  { %1296 = vmatmul.mubr.f32.vlgmr.msra.gmra.mrb[14].mxu1 %v1224_v35  ;;  %1918 = vmatprep.subr.bf16.mxu0 %v1917_v31 }
 0x12c   :  { %1916 = vmatpush1.bf16.xpose.msra.mxu1 %v1915_v34  ;;  %1455 = vmatprep.mubr.f32.mxu1 %v1388_v58 }
 0x12d   :  { %1922 = vmatprep.subr.bf16.mxu1 %v1921_v53 }
 0x131   :  { %1376 = vmatmul.mubr.f32.vlgmr.msra.gmra.mrb[16].mxu0 %v1304_v41 }
 0x132   :  { %1920 = vmatpush1.bf16.xpose.msra.mxu0 %v1919_v37  ;;  %1535 = vmatprep.mubr.f32.mxu0 %v1468_v46 }
 0x133   :  { %1456 = vmatmul.mubr.f32.vlgmr.msra.gmra.mrb[16].mxu1 %v1384_v49  ;;  %1926 = vmatprep.subr.bf16.mxu0 %v1925_v43 }
 0x134   :  { %1924 = vmatpush1.bf16.xpose.msra.mxu1 %v1923_v47  ;;  %1615 = vmatprep.mubr.f32.mxu1 %v1548_v52 }
 0x135   :  { %1930 = vmatprep.subr.bf16.mxu1 %v1929_v55 }
 0x139   :  { %1536 = vmatmul.mubr.f32.vlgmr.msra.gmra.mrb[18].mxu0 %v1464_v59 }
 0x13a   :  { %1928 = vmatpush1.bf16.xpose.msra.mxu0 %v1927_v32  ;;  %1695 = vmatprep.mubr.f32.mxu0 %v1628_v63 }
 0x13b   :  { %1616 = vmatmul.mubr.f32.vlgmr.msra.gmra.mrb[18].mxu1 %v1544_v1 }
 0x13c   :  { %1932 = vmatpush1.bf16.xpose.msra.mxu1 %v1931_v0  ;;  %1775 = vmatprep.mubr.f32.mxu1 %v1708_v3 }
 0x141   :  { %1696 = vmatmul.mubr.f32.vlgmr.msra.gmra.mrb[20].mxu0 %v1624_v4 }
 0x143   :  { %1776 = vmatmul.mubr.f32.vlgmr.msra.gmra.mrb[20].mxu1 %v1704_v44 }
 0x1dc   :  { %v455_v5 = vpop.f32.mrb[6].mxu0 }
 0x1dd   :  { %v457_v7 = vpop.f32.mrb[7].mxu0 }
 0x1de   :  { %v535_v57 = vpop.f32.mrb[6].mxu1 }
 0x1df   :  { %v1027_v50 = vrot.slane %v535_v57, 7  ;;  %v537_v8 = vpop.f32.mrb[7].mxu1 }
 0x1e1   :  { %v1029_v9 = vsel %vm1028_vm2, %v1027_v50, %v455_v5 }
 0x1e4   :  { %v615_v36 = vpop.f32.mrb[8].mxu0 }
 0x1e5   :  { %v1030_v61 = vrot.slane %v615_v36, 6  ;;  %v617_v10 = vpop.f32.mrb[9].mxu0 }
 0x1e6   :  { %v695_v11 = vpop.f32.mrb[8].mxu1 }
 0x1e7   :  { %v1032_v42 = vsel %vm1031_vm3, %v1030_v61, %v1029_v9  ;;  %v1033_v13 = vrot.slane %v695_v11, 5  ;;  %v697_v14 = vpop.f32.mrb[9].mxu1 }
 0x1e9   :  { %v1035_v60 = vsel %vm1034_vm4, %v1033_v13, %v1032_v42  ;;  %v1852_v13 = vld [vmem:[%s2417_s5] ss:$0 sm:$0xff] }
 0x1ec   :  { %v775_v15 = vpop.f32.mrb[10].mxu0 }
 0x1ed   :  { %v1036_v16 = vrot.slane %v775_v15, 4  ;;  %v777_v17 = vpop.f32.mrb[11].mxu0 }
 0x1ee   :  { %v855_v18 = vpop.f32.mrb[10].mxu1 }
 0x1ef   :  { %v1038_v19 = vsel %vm1037_vm5, %v1036_v16, %v1035_v60  ;;  %v1039_v20 = vrot.slane %v855_v18, 3  ;;  %v857_v21 = vpop.f32.mrb[11].mxu1 }
 0x1f1   :  { %v1041_v39 = vsel %vm1040_vm6, %v1039_v20, %v1038_v19 }
 0x1f4   :  { %v935_v22 = vpop.f32.mrb[12].mxu0 }
 0x1f5   :  { %v1042_v48 = vrot.slane %v935_v22, 2  ;;  %v937_v45 = vpop.f32.mrb[13].mxu0 }
 0x1f6   :  { %v1015_v51 = vpop.f32.mrb[12].mxu1 }
 0x1f7   :  { %v1044_v24 = vsel %vm1043_vm7, %v1042_v48, %v1041_v39  ;;  %v1045_v25 = vrot.slane %v1015_v51, 1  ;;  %v1017_v27 = vpop.f32.mrb[13].mxu1 }
 0x1f9   :  { %v1047_v29 = vsel %vm1046_vm8, %v1045_v25, %v1044_v24 }
 0x1fa   :  { %v1050_v52 = vsel %vm1049_vm9, %v1047_v29, 0.0 }
 0x1fb   :  { %v1051_v26 = vrot.slane %v1050_v52, 4 }
 0x1fc   :  { %v1217_v30 = vpop.f32.mrb[14].mxu0 }
 0x1fd   :  { %v1219_v31 = vpop.f32.mrb[15].mxu0  ;;  %v1052_v63 = vadd.f32 %v1051_v26, %v1050_v52 }
 0x1fe   :  { %v1297_v33 = vpop.f32.mrb[14].mxu1 }
 0x1ff   :  { %v1789_v34 = vrot.slane %v1297_v33, 7  ;;  %v1299_v35 = vpop.f32.mrb[15].mxu1  ;;  %v1053_v5 = vrot.slane %v1052_v63, 2 }
 0x201   :  { %v1790_v53 = vsel %vm1028_vm2, %v1789_v34, %v1217_v30  ;;  %v1054_v50 = vadd.f32 %v1053_v5, %v1052_v63 }
 0x203   :  { %v1055_v36 = vrot.slane %v1054_v50, 1 }
 0x204   :  { %v1377_v54 = vpop.f32.mrb[16].mxu0 }
 0x205   :  { %v1791_v58 = vrot.slane %v1377_v54, 6  ;;  %v1379_v62 = vpop.f32.mrb[17].mxu0  ;;  %v1056_v11 = vadd.f32 %v1055_v36, %v1054_v50 }
 0x206   :  { %v1457_v2 = vpop.f32.mrb[16].mxu1 }
 0x207   :  { %v1792_v6 = vsel %vm1031_vm3, %v1791_v58, %v1790_v53  ;;  %v1793_v12 = vrot.slane %v1457_v2, 5  ;;  %v1459_v37 = vpop.f32.mrb[17].mxu1 }
 0x209   :  { %v1794_v38 = vsel %vm1034_vm4, %v1793_v12, %v1792_v6 }
 0x20c   :  { %v1537_v40 = vpop.f32.mrb[18].mxu0 }
 0x20d   :  { %v1795_v41 = vrot.slane %v1537_v40, 4  ;;  %v1539_v43 = vpop.f32.mrb[19].mxu0 }
 0x20e   :  { %v1617_v46 = vpop.f32.mrb[18].mxu1 }
 0x20f   :  { %v1796_v47 = vsel %vm1037_vm5, %v1795_v41, %v1794_v38  ;;  %v1797_v49 = vrot.slane %v1617_v46, 3  ;;  %v1619_v55 = vpop.f32.mrb[19].mxu1 }
 0x211   :  { %v1798_v23 = vsel %vm1040_vm6, %v1797_v49, %v1796_v47 }
 0x214   :  { %v1697_v28 = vpop.f32.mrb[20].mxu0 }
 0x215   :  { %v1799_v32 = vrot.slane %v1697_v28, 2  ;;  %v1699_v56 = vpop.f32.mrb[21].mxu0 }
 0x216   :  { %v1777_v59 = vpop.f32.mrb[20].mxu1 }
 0x217   :  { %v1800_v0 = vsel %vm1043_vm7, %v1799_v32, %v1798_v23  ;;  %v1801_v1 = vrot.slane %v1777_v59, 1  ;;  %v1779_v3 = vpop.f32.mrb[21].mxu1 }
 0x219   :  { %v1802_v4 = vsel %vm1046_vm8, %v1801_v1, %v1800_v0 }
 0x21a   :  { %v1804_v44 = vsel %vm1049_vm9, %v1802_v4, 0.0 }
 0x21b   :  { %v1805_v7 = vrot.slane %v1804_v44, 4 }
 0x21d   :  { %v1806_v57 = vadd.f32 %v1805_v7, %v1804_v44 }
 0x21f   :  { %v1807_v8 = vrot.slane %v1806_v57, 2 }
 0x221   :  { %v1808_v9 = vadd.f32 %v1807_v8, %v1806_v57 }
 0x223   :  { %v1809_v61 = vrot.slane %v1808_v9, 1 }
 0x225   :  { %v1810_v10 = vadd.f32 %v1809_v61, %v1808_v9 }
 0x227   :  { %v1812_v42 = vrot.slane %v1810_v10, 7 }
 0x229   :  { %v1815_v14 = vsel %vm1814_vm10, %v1056_v11, %v1812_v42 }
 0x22a   :  { %v1823_v60 = vadd.f32 %v1852_v13, %v1815_v14 }
 0x22c   :  { %1825 = vst.msk [vmem:[#allocation5] sm:$0x3] %vm1824_vm11, %v1823_v60 }
 0x22d   :  { %1963 = shalt.err (!%p1960_p9)
}
 0x22e   :  { %s1964_s20 = scalar_lea.hbm %s2418_s6, 32 }
 0x22f   :  { %p1965_p10 = scmp.ne.s32.totalorder %s2418_s6, %s1964_s20  ;;  %p1968_p11 = scmp.lt.u32.totalorder %s1964_s20, %s2418_s6 }
 0x231   :  { %p1970_p12 = pnand %p1968_p11, %p1965_p10 }
 0x233   :  { %1973 = shalt.err (!%p1970_p12)
}
 0x234   :  { %1835 = dma.vmem_to_hbm [thread:$0]  %s1833_s16, 32, %s2418_s6, [#allocation3]  }
 0x235   :  { %1976 = dma.done.wait [#allocation3], 32  }
 0x236   :  { %1977 = vsyncadd [#allocation3], 4294967264 }
 0x237   :  { %1839 = vsyncpa [#allocation3], 1 }
 0x238   :  { %1840 = vsyncpa [#allocation4], 1 }

</bundles_post_ra>
